<compile_context>
chip_gen: v6e
topology: v6e:2x2x1
jax: 0.10.0
libtpu: 0.0.40
codegen_flags: <defaults>
</compile_context>

<pallas_src>
import jax
import jax.numpy as jnp
from jax.experimental import pallas as pl
from jax.experimental.pallas import tpu as pltpu


def _linear_kernel(w_ref, b_ref, x_ref, o_ref):
    # w_ref: SMEM (3,) f32, b_ref: SMEM (1,) f32
    # x_ref: VMEM (3, T) f32  (feature-major, batch on lanes)
    # o_ref: VMEM (1, T) f32
    x0 = x_ref[0:1, :]
    x1 = x_ref[1:2, :]
    x2 = x_ref[2:3, :]
    o_ref[...] = (w_ref[0] * x0 + w_ref[1] * x1 + w_ref[2] * x2) + b_ref[0]


def poly_model_forward(x, weight, bias, *, tile=65536):
    """y = x @ weight.T + bias, matching torch.nn.Linear(3, 1)."""
    n, f = x.shape
    assert f == 3 and weight.shape == (1, 3) and bias.shape == (1,)

    # Tile must be a multiple of 128 lanes; don't over-pad tiny batches.
    tile = 128 * pl.cdiv(tile, 128)
    tile = min(tile, 128 * pl.cdiv(n, 128))
    n_pad = tile * pl.cdiv(n, tile)

    # Lane-dense layout: (N, 3) -> (3, N_pad); padded batch lanes are zeros.
    xt = jnp.zeros((3, n_pad), x.dtype).at[:, :n].set(x.T)

    out_t = pl.pallas_call(
        _linear_kernel,
        out_shape=jax.ShapeDtypeStruct((1, n_pad), x.dtype),
        grid=(n_pad // tile,),
        in_specs=[
            pl.BlockSpec(memory_space=pltpu.MemorySpace.SMEM),  # weight (3,)
            pl.BlockSpec(memory_space=pltpu.MemorySpace.SMEM),  # bias   (1,)
            pl.BlockSpec((3, tile), lambda i: (0, i)),
        ],
        out_specs=pl.BlockSpec((1, tile), lambda i: (0, i)),
        compiler_params=pltpu.CompilerParams(
            dimension_semantics=("parallel",),
        ),
    )(weight.reshape(3), bias, xt)

    return out_t[0, :n].reshape(n, 1)


if __name__ == "__main__":
    key = jax.random.PRNGKey(0)
    k_x, k_w, k_b, k_x2 = jax.random.split(key, 4)

    in_features = 3
    out_features = 1

    # Deterministic parameter init mimicking nn.Linear default:
    # U(-1/sqrt(in_features), 1/sqrt(in_features))
    bound = 1.0 / jnp.sqrt(jnp.float32(in_features))
    weight = jax.random.uniform(
        k_w, (out_features, in_features), jnp.float32, -bound, bound
    )
    bias = jax.random.uniform(
        k_b, (out_features,), jnp.float32, -bound, bound
    )

    # Small primary check (batch=8).
    batch = 8
    x = jax.random.normal(k_x, (batch, in_features), jnp.float32)
    out = jax.block_until_ready(poly_model_forward(x, weight, bias))
    ref = x @ weight.T + bias
    assert out.shape == (batch, out_features)
    assert jnp.allclose(out, ref, atol=1e-5, rtol=1e-5)

    # Multi-tile + ragged-tail check (exercises grid > 1 and padding path).
    batch2 = 300
    x2 = jax.random.normal(k_x2, (batch2, in_features), jnp.float32)
    out2 = jax.block_until_ready(poly_model_forward(x2, weight, bias, tile=128))
    ref2 = x2 @ weight.T + bias
    assert out2.shape == (batch2, out_features)
    assert jnp.allclose(out2, ref2, atol=1e-5, rtol=1e-5)

    print("KERNEL_OK")
</pallas_src>

<mosaic_0001>
module attributes {stable_mosaic.version = 11 : i64} {
  func.func @_linear_kernel(%arg0: i32, %arg1: memref<3xf32, #tpu.memory_space<smem>>, %arg2: memref<1xf32, #tpu.memory_space<smem>>, %arg3: memref<3x128xf32, #tpu.memory_space<vmem>>, %arg4: memref<1x128xf32, #tpu.memory_space<vmem>>) attributes {dimension_semantics = [#tpu.dimension_semantics<parallel>], iteration_bounds = array<i64: 1>, scalar_prefetch = 0 : i64, scratch_operands = 0 : i64, tpu.core_type = #tpu.core_type<tc>, window_params = [{transform_indices = @transform_0, window_bounds = array<i64: 3>}, {transform_indices = @transform_1, window_bounds = array<i64: 1>}, {transform_indices = @transform_2, window_bounds = array<i64: 3, 128>}, {transform_indices = @transform_3, window_bounds = array<i64: 1, 128>}]} {
    %c0 = arith.constant 0 : index
    %c0_0 = arith.constant 0 : index
    %0 = vector.load %arg3[%c0, %c0_0] : memref<3x128xf32, #tpu.memory_space<vmem>>, vector<1x128xf32>
    %c1 = arith.constant 1 : index
    %c0_1 = arith.constant 0 : index
    %1 = vector.load %arg3[%c1, %c0_1] : memref<3x128xf32, #tpu.memory_space<vmem>>, vector<1x128xf32>
    %c2 = arith.constant 2 : index
    %c0_2 = arith.constant 0 : index
    %2 = vector.load %arg3[%c2, %c0_2] : memref<3x128xf32, #tpu.memory_space<vmem>>, vector<1x128xf32>
    %c0_3 = arith.constant 0 : index
    %3 = memref.load %arg1[%c0_3] : memref<3xf32, #tpu.memory_space<smem>>
    %4 = vector.broadcast %3 : f32 to vector<1x128xf32>
    %5 = arith.mulf %4, %0 : vector<1x128xf32>
    %c1_4 = arith.constant 1 : index
    %6 = memref.load %arg1[%c1_4] : memref<3xf32, #tpu.memory_space<smem>>
    %7 = vector.broadcast %6 : f32 to vector<1x128xf32>
    %8 = arith.mulf %7, %1 : vector<1x128xf32>
    %9 = arith.addf %5, %8 : vector<1x128xf32>
    %c2_5 = arith.constant 2 : index
    %10 = memref.load %arg1[%c2_5] : memref<3xf32, #tpu.memory_space<smem>>
    %11 = vector.broadcast %10 : f32 to vector<1x128xf32>
    %12 = arith.mulf %11, %2 : vector<1x128xf32>
    %13 = arith.addf %9, %12 : vector<1x128xf32>
    %c0_6 = arith.constant 0 : index
    %14 = memref.load %arg2[%c0_6] : memref<1xf32, #tpu.memory_space<smem>>
    %15 = vector.broadcast %14 : f32 to vector<1x128xf32>
    %16 = arith.addf %13, %15 : vector<1x128xf32>
    %c0_7 = arith.constant 0 : index
    %c0_8 = arith.constant 0 : index
    %17 = vector.load %arg4[%c0_7, %c0_8] : memref<1x128xf32, #tpu.memory_space<vmem>>, vector<1x128xf32>
    tpu.vector_store %arg4[%c0_7, %c0_8], %16 {strides = array<i32>} : memref<1x128xf32, #tpu.memory_space<vmem>>, vector<1x128xf32>,
    return
  }
  func.func @transform_0(%arg0: i32) -> i32 {
    %c0_i32 = arith.constant 0 : i32
    %c0_i32_0 = arith.constant 0 : i32
    return %c0_i32 : i32
  }
  func.func @transform_1(%arg0: i32) -> i32 {
    %c0_i32 = arith.constant 0 : i32
    %c0_i32_0 = arith.constant 0 : i32
    return %c0_i32 : i32
  }
  func.func @transform_2(%arg0: i32) -> (i32, i32) {
    %c0_i32 = arith.constant 0 : i32
    %c0_i32_0 = arith.constant 0 : i32
    return %c0_i32, %arg0 : i32, i32
  }
  func.func @transform_3(%arg0: i32) -> (i32, i32) {
    %c0_i32 = arith.constant 0 : i32
    %c0_i32_0 = arith.constant 0 : i32
    return %c0_i32, %arg0 : i32, i32
  }
}

</mosaic_0001>

<bundles_post_ra>
// kernel: tpu_custom_call.1
= control target key start
LH: loop header
LB: loop body
LE: loop exit
PB: predicated region body
PF: predicated region fallthrough
CT: control target
= control target key end

     0   :  { %9 = vsyncpa [#allocation6], 0  ;;  %s173_s0 = inlined_call_operand.vmem [shape: f32[3], index: 0, kind: input, shape index: {}]   ;;  %s174_s1 = inlined_call_operand.<no memory space> [shape: f32[1], index: 1, kind: input, shape index: {}]   ;;  %s175_s2 = inlined_call_operand.hbm [shape: f32[3,128], index: 2, kind: input, shape index: {}]   ;;  %s176_s3 = inlined_call_operand.hbm [shape: f32[1,128], index: 3, kind: output, shape index: {}]  }
   0x1   :  { %10 = vsyncpa [#allocation4], 0 }
   0x2   :  { %11 = vsyncpa [#allocation5], 0  ;;  %s18_s14 = sshll.u32 %s173_s0, 4  ;;  %s19_s14 = int_to_ptr.vmem [resolvable:$true] %s18_s14 }
   0x3   :  { %s80_s15 = scalar_lea.vmem %s19_s14, 16  ;;  %p85_p1 = scmp.lt.s32.totalorder %s19_s14, %s19_s14 }
   0x4   :  { %p81_p0 = scmp.ne.s32.totalorder %s19_s14, %s80_s15  ;;  %p86_p2 = scmp.lt.s32.totalorder %s80_s15, %s80_s15 }
   0x6   :  { %p87_p3 = por %p86_p2, %p85_p1 }
   0x8   :  { %p88_p4 = pnand %p87_p3, %p81_p0 }
   0xa   :  { %91 = shalt.err (!%p88_p4)
}
   0xb   :  { %s138_s16 = smov [#allocation3]   ;;  %s139_s17 = smov [#allocation7]  }
   0xc   :  { %21 = dma.vmem_to_smem %s19_s14, 16, %s138_s16, [#allocation6]  }
   0xd   :  { %s30_s18 = sshll.u32 %s139_s17, 4  ;;  %s31_s18 = int_to_ptr.vmem [resolvable:$true] %s30_s18 }
   0xe   :  { %s100_s19 = scalar_lea.vmem %s31_s18, 64  ;;  %p105_p6 = scmp.lt.s32.totalorder %s31_s18, %s31_s18 }
   0xf   :  { %p101_p5 = scmp.ne.s32.totalorder %s31_s18, %s100_s19  ;;  %p106_p7 = scmp.lt.s32.totalorder %s100_s19, %s100_s19 }
  0x11   :  { %p107_p8 = por %p106_p7, %p105_p6 }
  0x13   :  { %p108_p9 = pnand %p107_p8, %p101_p5 }
  0x15   :  { %111 = shalt.err (!%p108_p9)
}
  0x16   :  { %33 = dma.hbm_to_vmem [thread:$0]  %s175_s2, 64, %s31_s18, [#allocation4]  }
  0x17   :  { %132 = dma.done.wait [#allocation6], 16  }
  0x18   :  { %133 = vsyncadd [#allocation6], 4294967280 }
  0x19   :  { %134 = dma.done.wait [#allocation4], 64  }
  0x1a   :  { %135 = vsyncadd [#allocation4], 4294967232 }
  0x1b   :  { %40 = sfence }
  0x1c   :  { %s44_s21 = sld [smem:[#allocation3]]  ;;  %v41_v0 = vld [vmem:[#allocation7] sm:$0x1]  ;;  %v42_v1 = vld [vmem:[#allocation7 + $0x1] sm:$0x1]  ;;  %v56_v10 = vstv %s174_s1  ;;  %s140_s25 = smov [#allocation8]  }
  0x1d   :  { %s75_s22 = sld [smem:[#allocation3 + $0x1]]  ;;  %v43_v2 = vld [vmem:[#allocation7 + $0x2] sm:$0x1]  ;;  %s65_s26 = sshll.u32 %s140_s25, 4  ;;  %s66_s26 = int_to_ptr.vmem [resolvable:$true] %s65_s26 }
  0x1e   :  { %s76_s23 = sld [smem:[#allocation3 + $0x2]]  ;;  %s112_s27 = scalar_lea.vmem %s66_s26, 16 }
  0x1f   :  { %p113_p10 = scmp.ne.s32.totalorder %s66_s26, %s112_s27  ;;  %s116_s28 = scalar_lea.vmem %s66_s26, 32 }
  0x20   :  { %p117_p11 = scmp.lt.s32.totalorder %s66_s26, %s66_s26  ;;  %p118_p12 = scmp.lt.s32.totalorder %s116_s28, %s112_s27 }
  0x22   :  { %v45_v3 = vstv %s44_s21  ;;  %p119_p13 = por %p118_p12, %p117_p11 }
  0x23   :  { %v46_v4 = vmul.f32 %v45_v3, %v41_v0  ;;  %v48_v5 = vstv %s75_s22 }
  0x24   :  { %v49_v6 = vmul.f32 %v48_v5, %v42_v1  ;;  %v52_v7 = vstv %s76_s23  ;;  %p120_p0 = pnand %p119_p13, %p113_p10 }
  0x25   :  { %v53_v8 = vmul.f32 %v52_v7, %v43_v2 }
  0x26   :  { %v50_v9 = vadd.f32 %v49_v6, %v46_v4 }
  0x28   :  { %v54_v11 = vadd.f32 %v53_v8, %v50_v9 }
  0x2a   :  { %v57_v12 = vadd.f32 %v56_v10, %v54_v11 }
  0x2c   :  { %58 = vst [vmem:[#allocation8] sm:$0x1] %v57_v12 }
  0x2d   :  { %123 = shalt.err (!%p120_p0)
}
  0x2e   :  { %68 = dma.vmem_to_hbm [thread:$0]  %s66_s26, 16, %s176_s3, [#allocation5]  }
  0x2f   :  { %136 = dma.done.wait [#allocation5], 16  }
  0x30   :  { %137 = vsyncadd [#allocation5], 4294967280 }
  0x31   :  { %72 = vsyncpa [#allocation4], 1 }
  0x32   :  { %73 = vsyncpa [#allocation5], 1 }
  0x33   :  { %74 = vsyncpa [#allocation6], 1 }

</bundles_post_ra>
